<compile_context>
chip_gen: v7x
topology: tpu7x:2x2x1
jax: 0.10.0
libtpu: 0.0.40
codegen_flags: <defaults>
</compile_context>

<pallas_src>
import functools

import jax
import jax.numpy as jnp
from jax import lax
from jax.experimental import pallas as pl
from jax.experimental.pallas import tpu as pltpu

LANE = 128      # vreg lane width: hidden & class dims padded to this
SUBLANE = 8     # sublane granularity for the batch (second-to-last) dim


def _round_up(n, m):
    return ((n + m - 1) // m) * m


def mlp_kernel(x_ref, w1_ref, b1_ref, w2_ref, b2_ref, w3_ref, b3_ref, o_ref,
               *, num_classes):
    # One (TM, IN) batch tile; all weights/biases are VMEM-resident.
    x = x_ref[...]                                                   # bf16

    # layer 1: Linear + ReLU  (MXU accumulates in f32, elementwise in f32)
    h1 = jnp.dot(x, w1_ref[...], preferred_element_type=jnp.float32) + b1_ref[...]
    h1 = jnp.maximum(h1, 0.0).astype(w2_ref.dtype)

    # layer 2: Linear + ReLU
    h2 = jnp.dot(h1, w2_ref[...], preferred_element_type=jnp.float32) + b2_ref[...]
    h2 = jnp.maximum(h2, 0.0).astype(w3_ref.dtype)

    # layer 3: Linear + softmax over the (padded) class axis
    logits = jnp.dot(h2, w3_ref[...], preferred_element_type=jnp.float32) + b3_ref[...]

    # padded class lanes must not receive probability mass
    lane_idx = lax.broadcasted_iota(jnp.int32, logits.shape, 1)
    logits = jnp.where(lane_idx < num_classes, logits, -jnp.inf)

    # numerically stable softmax; divide goes to the EUP (approx reciprocal)
    m = jnp.max(logits, axis=-1, keepdims=True)
    e = jnp.exp(logits - m)
    denom = jnp.sum(e, axis=-1, keepdims=True)
    o_ref[...] = (e * pl.reciprocal(denom, approx=True)).astype(o_ref.dtype)


def mnist_network_forward(x_nchw, params, *, tm=1024):
    """Forward pass matching the PyTorch mnist_network module."""
    w1, b1, w2, b2, w3, b3 = params
    in_nodes = w1.shape[0]
    hidden = w1.shape[1]
    out_nodes = w3.shape[1]

    # glue: flatten exactly like torch's x.view(-1, self.ins)
    x2d = x_nchw.reshape(-1, in_nodes)
    batch = x2d.shape[0]

    # ---- lane-pad hidden (32 -> 128) and classes (10 -> 128) with zeros ----
    hp = _round_up(hidden, LANE)
    cp = _round_up(out_nodes, LANE)
    f32, bf16 = jnp.float32, jnp.bfloat16

    w1p = jnp.zeros((in_nodes, hp), f32).at[:, :hidden].set(w1).astype(bf16)
    b1p = jnp.zeros((1, hp), f32).at[:, :hidden].set(b1.reshape(1, -1))
    w2p = jnp.zeros((hp, hp), f32).at[:hidden, :hidden].set(w2).astype(bf16)
    b2p = jnp.zeros((1, hp), f32).at[:, :hidden].set(b2.reshape(1, -1))
    w3p = jnp.zeros((hp, cp), f32).at[:hidden, :out_nodes].set(w3).astype(bf16)
    b3p = jnp.zeros((1, cp), f32).at[:, :out_nodes].set(b3.reshape(1, -1))

    # ---- batch tiling: pad rows so the grid divides evenly ----
    tm_eff = min(tm, _round_up(batch, SUBLANE))
    padded_b = _round_up(batch, tm_eff)
    x_pad = jnp.zeros((padded_b, in_nodes), bf16).at[:batch].set(x2d.astype(bf16))

    grid = (padded_b // tm_eff,)
    const = lambda shape: pl.BlockSpec(shape, lambda i: (0,) * len(shape))

    flops = 2 * padded_b * (in_nodes * hp + hp * hp + hp * cp)
    bytes_accessed = (x_pad.size * 2 + padded_b * cp * 4
                      + (w1p.size + w2p.size + w3p.size) * 2
                      + (b1p.size + b2p.size + b3p.size) * 4)

    out_padded = pl.pallas_call(
        functools.partial(mlp_kernel, num_classes=out_nodes),
        out_shape=jax.ShapeDtypeStruct((padded_b, cp), jnp.float32),
        grid=grid,
        in_specs=[
            pl.BlockSpec((tm_eff, in_nodes), lambda i: (i, 0)),   # batch-tiled x
            const(w1p.shape), const(b1p.shape),                   # VMEM-resident
            const(w2p.shape), const(b2p.shape),
            const(w3p.shape), const(b3p.shape),
        ],
        out_specs=pl.BlockSpec((tm_eff, cp), lambda i: (i, 0)),   # lane-dense out
        compiler_params=pltpu.CompilerParams(
            dimension_semantics=("parallel",)),                   # 2-TC sharding on v7x
        cost_estimate=pl.CostEstimate(
            flops=flops,
            transcendentals=padded_b * cp,
            bytes_accessed=bytes_accessed),
    )(x_pad, w1p, b1p, w2p, b2p, w3p, b3p)

    # strip batch padding and padded class lanes
    return out_padded[:batch, :out_nodes]


def init_params(key, input_nodes, hidden_nodes, output_nodes):
    """Deterministic init, torch.nn.Linear-style uniform bounds (fan_in)."""
    ks = jax.random.split(key, 6)

    def linear(kw, kb, fan_in, fan_out):
        bound = 1.0 / jnp.sqrt(jnp.float32(fan_in))
        w = jax.random.uniform(kw, (fan_in, fan_out), jnp.float32, -bound, bound)
        b = jax.random.uniform(kb, (1, fan_out), jnp.float32, -bound, bound)
        return w, b

    w1, b1 = linear(ks[0], ks[1], input_nodes, hidden_nodes)
    w2, b2 = linear(ks[2], ks[3], hidden_nodes, hidden_nodes)
    w3, b3 = linear(ks[4], ks[5], hidden_nodes, output_nodes)
    return (w1, b1, w2, b2, w3, b3)


def reference_forward(x_nchw, params):
    """Pure-JAX f32 reference with the original module's semantics."""
    w1, b1, w2, b2, w3, b3 = params
    x = x_nchw.reshape(-1, w1.shape[0]).astype(jnp.float32)
    h1 = jnp.maximum(x @ w1 + b1, 0.0)
    h2 = jnp.maximum(h1 @ w2 + b2, 0.0)
    return jax.nn.softmax(h2 @ w3 + b3, axis=-1)


if __name__ == "__main__":
    # Small shapes consistent with the module: 8x8 single-channel "images",
    # input_nodes = 1*8*8 = 64, hidden = 32, output = 10 classes.
    batch, C, H, W = 8, 1, 8, 8
    input_nodes, hidden_nodes, output_nodes = C * H * W, 32, 10

    key = jax.random.PRNGKey(0)
    k_x, k_p = jax.random.split(key)

    x = jax.random.normal(k_x, (batch, C, H, W), jnp.float32)  # NCHW
    params = init_params(k_p, input_nodes, hidden_nodes, output_nodes)

    out = mnist_network_forward(x, params)
    out = jax.block_until_ready(out)

    assert out.shape == (batch, output_nodes)

    # sanity: softmax rows sum to ~1 (bf16 matmuls + approx reciprocal)
    row_sums = jnp.sum(out, axis=1)
    assert bool(jnp.all(jnp.abs(row_sums - 1.0) < 1e-2)), row_sums

    # correctness vs. pure-JAX f32 reference
    ref = reference_forward(x, params)
    assert bool(jnp.all(jnp.abs(out - ref) < 2e-2)), jnp.max(jnp.abs(out - ref))

    print("KERNEL_OK")
</pallas_src>

<mosaic_0001>
module attributes {stable_mosaic.version = 11 : i64} {
  func.func @mlp_kernel(%arg0: i32, %arg1: memref<8x64xbf16, #tpu.memory_space<vmem>>, %arg2: memref<64x128xbf16, #tpu.memory_space<vmem>>, %arg3: memref<1x128xf32, #tpu.memory_space<vmem>>, %arg4: memref<128x128xbf16, #tpu.memory_space<vmem>>, %arg5: memref<1x128xf32, #tpu.memory_space<vmem>>, %arg6: memref<128x128xbf16, #tpu.memory_space<vmem>>, %arg7: memref<1x128xf32, #tpu.memory_space<vmem>>, %arg8: memref<8x128xf32, #tpu.memory_space<vmem>>) attributes {dimension_semantics = [#tpu.dimension_semantics<parallel>], iteration_bounds = array<i64: 1>, scalar_prefetch = 0 : i64, scratch_operands = 0 : i64, tpu.core_type = #tpu.core_type<tc>, window_params = [{transform_indices = @transform_0, window_bounds = array<i64: 8, 64>}, {pipeline_mode = #tpu.pipeline_mode<synchronous>, transform_indices = @transform_1, window_bounds = array<i64: 64, 128>}, {pipeline_mode = #tpu.pipeline_mode<synchronous>, transform_indices = @transform_2, window_bounds = array<i64: 1, 128>}, {pipeline_mode = #tpu.pipeline_mode<synchronous>, transform_indices = @transform_3, window_bounds = array<i64: 128, 128>}, {pipeline_mode = #tpu.pipeline_mode<synchronous>, transform_indices = @transform_4, window_bounds = array<i64: 1, 128>}, {pipeline_mode = #tpu.pipeline_mode<synchronous>, transform_indices = @transform_5, window_bounds = array<i64: 128, 128>}, {pipeline_mode = #tpu.pipeline_mode<synchronous>, transform_indices = @transform_6, window_bounds = array<i64: 1, 128>}, {transform_indices = @transform_7, window_bounds = array<i64: 8, 128>}]} {
    %c0 = arith.constant 0 : index
    %c0_0 = arith.constant 0 : index
    %0 = vector.load %arg1[%c0, %c0_0] : memref<8x64xbf16, #tpu.memory_space<vmem>>, vector<8x64xbf16>
    %c0_1 = arith.constant 0 : index
    %c0_2 = arith.constant 0 : index
    %1 = vector.load %arg2[%c0_1, %c0_2] : memref<64x128xbf16, #tpu.memory_space<vmem>>, vector<64x128xbf16>
    %cst = arith.constant dense<0.000000e+00> : vector<8x128xf32>
    %2 = tpu.matmul %0, %1, %cst {dimension_numbers = #tpu.dot_dimension_numbers<[1], [0], [0], [1], [0, 0, 1, 1], [], []>} : vector<8x64xbf16>, vector<64x128xbf16>, vector<8x128xf32> -> vector<8x128xf32>
    %c0_3 = arith.constant 0 : index
    %c0_4 = arith.constant 0 : index
    %3 = vector.load %arg3[%c0_3, %c0_4] : memref<1x128xf32, #tpu.memory_space<vmem>>, vector<1x128xf32>
    %4 = vector.broadcast %3 : vector<1x128xf32> to vector<8x128xf32>
    %5 = arith.addf %2, %4 : vector<8x128xf32>
    %cst_5 = arith.constant 0.000000e+00 : f32
    %6 = vector.broadcast %cst_5 : f32 to vector<8x128xf32>
    %7 = arith.maximumf %5, %6 : vector<8x128xf32>
    %8 = arith.truncf %7 : vector<8x128xf32> to vector<8x128xbf16>
    %c0_6 = arith.constant 0 : index
    %c0_7 = arith.constant 0 : index
    %9 = vector.load %arg4[%c0_6, %c0_7] : memref<128x128xbf16, #tpu.memory_space<vmem>>, vector<128x128xbf16>
    %cst_8 = arith.constant dense<0.000000e+00> : vector<8x128xf32>
    %10 = tpu.matmul %8, %9, %cst_8 {dimension_numbers = #tpu.dot_dimension_numbers<[1], [0], [0], [1], [0, 0, 1, 1], [], []>} : vector<8x128xbf16>, vector<128x128xbf16>, vector<8x128xf32> -> vector<8x128xf32>
    %c0_9 = arith.constant 0 : index
    %c0_10 = arith.constant 0 : index
    %11 = vector.load %arg5[%c0_9, %c0_10] : memref<1x128xf32, #tpu.memory_space<vmem>>, vector<1x128xf32>
    %12 = vector.broadcast %11 : vector<1x128xf32> to vector<8x128xf32>
    %13 = arith.addf %10, %12 : vector<8x128xf32>
    %cst_11 = arith.constant 0.000000e+00 : f32
    %14 = vector.broadcast %cst_11 : f32 to vector<8x128xf32>
    %15 = arith.maximumf %13, %14 : vector<8x128xf32>
    %16 = arith.truncf %15 : vector<8x128xf32> to vector<8x128xbf16>
    %c0_12 = arith.constant 0 : index
    %c0_13 = arith.constant 0 : index
    %17 = vector.load %arg6[%c0_12, %c0_13] : memref<128x128xbf16, #tpu.memory_space<vmem>>, vector<128x128xbf16>
    %cst_14 = arith.constant dense<0.000000e+00> : vector<8x128xf32>
    %18 = tpu.matmul %16, %17, %cst_14 {dimension_numbers = #tpu.dot_dimension_numbers<[1], [0], [0], [1], [0, 0, 1, 1], [], []>} : vector<8x128xbf16>, vector<128x128xbf16>, vector<8x128xf32> -> vector<8x128xf32>
    %c0_15 = arith.constant 0 : index
    %c0_16 = arith.constant 0 : index
    %19 = vector.load %arg7[%c0_15, %c0_16] : memref<1x128xf32, #tpu.memory_space<vmem>>, vector<1x128xf32>
    %20 = vector.broadcast %19 : vector<1x128xf32> to vector<8x128xf32>
    %21 = arith.addf %18, %20 : vector<8x128xf32>
    %22 = tpu.iota {dimensions = array<i32: 1>} : vector<8x128xi32>
    %c10_i32 = arith.constant 10 : i32
    %23 = vector.broadcast %c10_i32 : i32 to vector<8x128xi32>
    %24 = arith.cmpi slt, %22, %23 : vector<8x128xi32>
    %cst_17 = arith.constant 0xFF800000 : f32
    %25 = vector.broadcast %cst_17 : f32 to vector<8x128xf32>
    %26 = arith.select %24, %21, %25 : vector<8x128xi1>, vector<8x128xf32>
    %cst_18 = arith.constant dense<0xFF800000> : vector<8xf32>
    %27 = vector.multi_reduction <maximumf>, %26, %cst_18 [1] : vector<8x128xf32> to vector<8xf32>
    %28 = vector.shape_cast %27 : vector<8xf32> to vector<8x1xf32>
    %29 = vector.broadcast %28 : vector<8x1xf32> to vector<8x128xf32>
    %30 = arith.subf %26, %29 : vector<8x128xf32>
    %31 = math.exp %30 : vector<8x128xf32>
    %cst_19 = arith.constant dense<0.000000e+00> : vector<8xf32>
    %32 = vector.multi_reduction <add>, %31, %cst_19 [1] : vector<8x128xf32> to vector<8xf32>
    %33 = vector.shape_cast %32 : vector<8xf32> to vector<8x1xf32>
    %34 = tpu.reciprocal %33 {approx = true} : vector<8x1xf32> -> vector<8x1xf32>
    %35 = vector.broadcast %34 : vector<8x1xf32> to vector<8x128xf32>
    %36 = arith.mulf %31, %35 : vector<8x128xf32>
    %c0_20 = arith.constant 0 : index
    %c0_21 = arith.constant 0 : index
    %37 = vector.load %arg8[%c0_20, %c0_21] : memref<8x128xf32, #tpu.memory_space<vmem>>, vector<8x128xf32>
    tpu.vector_store %arg8[%c0_20, %c0_21], %36 {strides = array<i32>} : memref<8x128xf32, #tpu.memory_space<vmem>>, vector<8x128xf32>,
    return
  }
  func.func @transform_0(%arg0: i32) -> (i32, i32) {
    %c0_i32 = arith.constant 0 : i32
    %c0_i32_0 = arith.constant 0 : i32
    return %arg0, %c0_i32 : i32, i32
  }
  func.func @transform_1(%arg0: i32) -> (i32, i32) {
    %c0_i32 = arith.constant 0 : i32
    %c0_i32_0 = arith.constant 0 : i32
    %c0_i32_1 = arith.constant 0 : i32
    return %c0_i32, %c0_i32_0 : i32, i32
  }
  func.func @transform_2(%arg0: i32) -> (i32, i32) {
    %c0_i32 = arith.constant 0 : i32
    %c0_i32_0 = arith.constant 0 : i32
    %c0_i32_1 = arith.constant 0 : i32
    return %c0_i32, %c0_i32_0 : i32, i32
  }
  func.func @transform_3(%arg0: i32) -> (i32, i32) {
    %c0_i32 = arith.constant 0 : i32
    %c0_i32_0 = arith.constant 0 : i32
    %c0_i32_1 = arith.constant 0 : i32
    return %c0_i32, %c0_i32_0 : i32, i32
  }
  func.func @transform_4(%arg0: i32) -> (i32, i32) {
    %c0_i32 = arith.constant 0 : i32
    %c0_i32_0 = arith.constant 0 : i32
    %c0_i32_1 = arith.constant 0 : i32
    return %c0_i32, %c0_i32_0 : i32, i32
  }
  func.func @transform_5(%arg0: i32) -> (i32, i32) {
    %c0_i32 = arith.constant 0 : i32
    %c0_i32_0 = arith.constant 0 : i32
    %c0_i32_1 = arith.constant 0 : i32
    return %c0_i32, %c0_i32_0 : i32, i32
  }
  func.func @transform_6(%arg0: i32) -> (i32, i32) {
    %c0_i32 = arith.constant 0 : i32
    %c0_i32_0 = arith.constant 0 : i32
    %c0_i32_1 = arith.constant 0 : i32
    return %c0_i32, %c0_i32_0 : i32, i32
  }
  func.func @transform_7(%arg0: i32) -> (i32, i32) {
    %c0_i32 = arith.constant 0 : i32
    %c0_i32_0 = arith.constant 0 : i32
    return %arg0, %c0_i32 : i32, i32
  }
}

</mosaic_0001>

<bundles_post_ra>
// kernel: tpu_custom_call.1
= control target key start
LH: loop header
LB: loop body
LE: loop exit
PB: predicated region body
PF: predicated region fallthrough
CT: control target
= control target key end

     0   :  { %12 = vsyncpa [#allocation3], 0  ;;  %s825_s0 = inlined_call_operand.hbm [shape: bf16[8,64], index: 0, kind: input, shape index: {}]   ;;  %s826_s1 = inlined_call_operand.hbm [shape: bf16[64,128], index: 1, kind: input, shape index: {}]   ;;  %s827_s2 = inlined_call_operand.vmem [shape: f32[1,128], index: 2, kind: input, shape index: {}]   ;;  %s828_s3 = inlined_call_operand.hbm [shape: bf16[128,128], index: 3, kind: input, shape index: {}]   ;;  %s829_s4 = inlined_call_operand.vmem [shape: f32[1,128], index: 4, kind: input, shape index: {}]   ;;  %s830_s5 = inlined_call_operand.hbm [shape: bf16[128,128], index: 5, kind: input, shape index: {}]   ;;  %s831_s6 = inlined_call_operand.vmem [shape: f32[1,128], index: 6, kind: input, shape index: {}]   ;;  %s832_s7 = inlined_call_operand.hbm [shape: f32[8,128], index: 7, kind: output, shape index: {}]  }
   0x1   :  { %13 = vsyncpa [#allocation6], 0 }
   0x2   :  { %14 = vsyncpa [#allocation9], 0 }
   0x3   :  { %15 = vsyncpa [#allocation4], 0  ;;  %s672_s24 = smov [#allocation5]   ;;  %s554_s28 = scalar_lea.hbm %s826_s1, 512 }
   0x4   :  { %s31_s25 = sshll.u32 %s672_s24, 4  ;;  %p555_p0 = scmp.ne.s32.totalorder %s826_s1, %s554_s28  ;;  %s32_s25 = int_to_ptr.vmem [resolvable:$true] %s31_s25 }
   0x5   :  { %p558_p1 = scmp.lt.u32.totalorder %s554_s28, %s826_s1 }
   0x7   :  { %p560_p2 = pnand %p558_p1, %p555_p0 }
   0x9   :  { %563 = shalt.err (!%p560_p2)
}
   0xa   :  { %s564_s10 = scalar_lea.vmem %s32_s25, 512  ;;  %p569_p4 = scmp.lt.s32.totalorder %s32_s25, %s32_s25 }
   0xb   :  { %p565_p3 = scmp.ne.s32.totalorder %s32_s25, %s564_s10  ;;  %p570_p5 = scmp.lt.s32.totalorder %s564_s10, %s564_s10 }
   0xd   :  { %p571_p6 = por %p570_p5, %p569_p4 }
   0xf   :  { %p572_p7 = pnand %p571_p6, %p565_p3 }
  0x11   :  { %575 = shalt.err (!%p572_p7)
}
  0x12   :  { %s673_s11 = smov 64   ;;  %s674_s12 = smov 4  }
  0x13   :  { %37 = dma.hbm_to_vmem [thread:$0]  %s826_s1, 512, %s32_s25, [#allocation6], %s673_s11, %s673_s11, %s674_s12  }
  0x14   :  { %s675_s15 = smov [#allocation2]   ;;  %s676_s17 = smov [#allocation7]  }
  0x15   :  { %s22_s16 = sshll.u32 %s675_s15, 4  ;;  %s45_s18 = sshll.u32 %s676_s17, 4  ;;  %s23_s16 = int_to_ptr.vmem [resolvable:$true] %s22_s16  ;;  %s46_s18 = int_to_ptr.vmem [resolvable:$true] %s45_s18 }
  0x16   :  { %s576_s21 = scalar_lea.hbm %s825_s0, 64 }
  0x17   :  { %p577_p8 = scmp.ne.s32.totalorder %s825_s0, %s576_s21  ;;  %p580_p9 = scmp.lt.u32.totalorder %s576_s21, %s825_s0 }
  0x19   :  { %p582_p10 = pnand %p580_p9, %p577_p8 }
  0x1b   :  { %585 = shalt.err (!%p582_p10)
}
  0x1c   :  { %s586_s1 = scalar_lea.vmem %s23_s16, 64  ;;  %p591_p12 = scmp.lt.s32.totalorder %s23_s16, %s23_s16 }
  0x1d   :  { %p587_p11 = scmp.ne.s32.totalorder %s23_s16, %s586_s1  ;;  %p592_p13 = scmp.lt.s32.totalorder %s586_s1, %s586_s1 }
  0x1f   :  { %p593_p0 = por %p592_p13, %p591_p12 }
  0x21   :  { %p594_p1 = pnand %p593_p0, %p587_p11 }
  0x23   :  { %597 = shalt.err (!%p594_p1)
}
  0x24   :  { %25 = dma.hbm_to_vmem [thread:$0]  %s825_s0, 64, %s23_s16, [#allocation3]  }
  0x25   :  { %s598_s30 = scalar_lea.hbm %s828_s3, 1024 }
  0x26   :  { %p599_p2 = scmp.ne.s32.totalorder %s828_s3, %s598_s30  ;;  %p602_p3 = scmp.lt.u32.totalorder %s598_s30, %s828_s3 }
  0x28   :  { %p604_p4 = pnand %p602_p3, %p599_p2 }
  0x2a   :  { %607 = shalt.err (!%p604_p4)
}
  0x2b   :  { %s608_s14 = scalar_lea.vmem %s46_s18, 1024  ;;  %p613_p6 = scmp.lt.s32.totalorder %s46_s18, %s46_s18 }
  0x2c   :  { %p609_p5 = scmp.ne.s32.totalorder %s46_s18, %s608_s14  ;;  %p614_p7 = scmp.lt.s32.totalorder %s608_s14, %s608_s14 }
  0x2e   :  { %p615_p8 = por %p614_p7, %p613_p6 }
  0x30   :  { %p616_p9 = pnand %p615_p8, %p609_p5 }
  0x32   :  { %619 = shalt.err (!%p616_p9)
}
  0x33   :  { %51 = dma.hbm_to_vmem [thread:$0]  %s828_s3, 1024, %s46_s18, [#allocation6], %s673_s11, %s673_s11, %s674_s12  }
  0x34   :  { %s677_s16 = smov [#allocation8]   ;;  %s620_s21 = scalar_lea.hbm %s830_s5, 1024 }
  0x35   :  { %s59_s17 = sshll.u32 %s677_s16, 4  ;;  %p621_p10 = scmp.ne.s32.totalorder %s830_s5, %s620_s21  ;;  %s60_s17 = int_to_ptr.vmem [resolvable:$true] %s59_s17 }
  0x36   :  { %p624_p11 = scmp.lt.u32.totalorder %s620_s21, %s830_s5 }
  0x38   :  { %p626_p12 = pnand %p624_p11, %p621_p10 }
  0x3a   :  { %629 = shalt.err (!%p626_p12)
}
  0x3b   :  { %s630_s1 = scalar_lea.vmem %s60_s17, 1024  ;;  %p635_p0 = scmp.lt.s32.totalorder %s60_s17, %s60_s17 }
  0x3c   :  { %p631_p13 = scmp.ne.s32.totalorder %s60_s17, %s630_s1  ;;  %p636_p1 = scmp.lt.s32.totalorder %s630_s1, %s630_s1 }
  0x3e   :  { %p637_p2 = por %p636_p1, %p635_p0 }
  0x40   :  { %p638_p3 = pnand %p637_p2, %p631_p13 }
  0x42   :  { %641 = shalt.err (!%p638_p3)
}
  0x43   :  { %65 = dma.hbm_to_vmem [thread:$0]  %s830_s5, 1024, %s60_s17, [#allocation9], %s673_s11, %s673_s11, %s674_s12  }
  0x44   :  { %664 = dma.done.wait [#allocation3], 64  }
  0x45   :  { %665 = vsyncadd [#allocation3], 4294967232 }
  0x46   :  { %666 = dma.done.wait [#allocation6], 1536  }
  0x47   :  { %667 = vsyncadd [#allocation6], 4294965760 }
  0x48   :  { %668 = dma.done.wait [#allocation9], 1024  }
  0x49   :  { %669 = vsyncadd [#allocation9], 4294966272  ;;  %v678_v0 = vmov 0.0   ;;  %vm679_vm0 = vmmov 0   ;;  %v530_v1 = vld [vmem:[#allocation5] sm:$0xff]   ;;  %v531_v2 = vld [vmem:[#allocation5 + $0x8] sm:$0xff]   ;;  %v391_v38 = vlaneseq }
  0x4a   :  { %469 = vmatprep.subr.bf16.mxu0 %v678_v0  ;;  %477 = vmatprep.mubr.msk.bf16.mxu0 %vm679_vm0, %v678_v0  ;;  %v534_v3 = vld [vmem:[#allocation7] sm:$0xff]   ;;  %v532_v4 = vld [vmem:[#allocation5 + $0x10] sm:$0xff]   ;;  %v535_v5 = vld [vmem:[#allocation7 + $0x8] sm:$0xff]   ;;  %vm121_vm1 = vcmask 523264  }
  0x4b   :  { %481 = vmatprep.subr.bf16.mxu1 %v678_v0  ;;  %497 = vmatprep.mubr.msk.bf16.mxu1 %vm679_vm0, %v678_v0  ;;  %v533_v6 = vld [vmem:[#allocation5 + $0x18] sm:$0xff]   ;;  %v536_v7 = vld [vmem:[#allocation7 + $0x10] sm:$0xff]   ;;  %v538_v10 = vld [vmem:[#allocation7 + $0x20] sm:$0xff]   ;;  %v392_v39 = vand.u32 127, %v391_v38 }
  0x4c   :  { %470 = vmatpush3.bf16.msra.mxu0 %v530_v1  ;;  %482 = vmatpush3.bf16.msra.mxu1 %v534_v3  ;;  %v81_v8 = vld [vmem:[#allocation2] sm:$0xf]  ;;  %v539_v11 = vld [vmem:[#allocation7 + $0x28] sm:$0xff]   ;;  %v540_v12 = vld [vmem:[#allocation7 + $0x30] sm:$0xff]  }
  0x4d   :  { %471 = vmatprep.subr.bf16.mxu0 %v678_v0  ;;  %483 = vmatprep.subr.bf16.mxu1 %v678_v0  ;;  %v537_v9 = vld [vmem:[#allocation7 + $0x18] sm:$0xff]   ;;  %v542_v14 = vld [vmem:[#allocation8] sm:$0xff]   ;;  %v543_v15 = vld [vmem:[#allocation8 + $0x8] sm:$0xff]   ;;  %vm393_vm2 = vcmp.lt.s32.totalorder %v392_v39, 10 }
  0x4e   :  { %v541_v13 = vld [vmem:[#allocation7 + $0x38] sm:$0xff]   ;;  %v544_v16 = vld [vmem:[#allocation8 + $0x10] sm:$0xff]   ;;  %v546_v18 = vld [vmem:[#allocation8 + $0x20] sm:$0xff]  }
  0x4f   :  { %v545_v17 = vld [vmem:[#allocation8 + $0x18] sm:$0xff]   ;;  %v547_v19 = vld [vmem:[#allocation8 + $0x28] sm:$0xff]   ;;  %v548_v28 = vld [vmem:[#allocation8 + $0x30] sm:$0xff]  }
  0x50   :  { %472 = vmatpush3.bf16.msra.mxu0 %v531_v2  ;;  %484 = vmatpush3.bf16.msra.mxu1 %v535_v5  ;;  %v422_v20 = vld [vmem:[%s827_s2] ss:$0 sm:$0xff] }
  0x51   :  { %473 = vmatprep.subr.bf16.mxu0 %v678_v0  ;;  %485 = vmatprep.subr.bf16.mxu1 %v678_v0  ;;  %v549_v29 = vld [vmem:[#allocation8 + $0x38] sm:$0xff]  }
  0x52   :  { %v428_v30 = vld [vmem:[%s829_s4] ss:$0 sm:$0xff]  ;;  %s680_s4 = smov [#allocation10]  }
  0x53   :  { %v437_v40 = vld [vmem:[%s831_s6] ss:$0 sm:$0xff]  ;;  %s411_s28 = sshll.u32 %s680_s4, 4  ;;  %s412_s28 = int_to_ptr.vmem [resolvable:$true] %s411_s28 }
  0x54   :  { %474 = vmatpush3.bf16.msra.mxu0 %v532_v4  ;;  %486 = vmatpush3.bf16.msra.mxu1 %v536_v7  ;;  %s642_s6 = scalar_lea.vmem %s412_s28, 128  ;;  %p647_p5 = scmp.lt.s32.totalorder %s412_s28, %s412_s28 }
  0x55   :  { %475 = vmatprep.subr.bf16.mxu0 %v678_v0  ;;  %487 = vmatprep.subr.bf16.mxu1 %v678_v0  ;;  %p643_p4 = scmp.ne.s32.totalorder %s412_s28, %s642_s6  ;;  %p648_p6 = scmp.lt.s32.totalorder %s642_s6, %s642_s6 }
  0x57   :  { %p649_p7 = por %p648_p6, %p647_p5 }
  0x58   :  { %476 = vmatpush3.bf16.msra.mxu0 %v533_v6  ;;  %488 = vmatpush3.bf16.msra.mxu1 %v537_v9 }
  0x59   :  { %501 = vmatprep.subr.bf16.mxu0 %v678_v0  ;;  %489 = vmatprep.subr.bf16.mxu1 %v678_v0  ;;  %p650_p8 = pnand %p649_p7, %p643_p4 }
  0x5b   :  { %478 = vmatmul.mubr.msk.bf16.vlgmr.msra.gmra.mrb[0].mxu0 %vm121_vm1, %v81_v8 }
  0x5c   :  { %517 = vmatprep.mubr.msk.bf16.mxu0 %vm679_vm0, %v678_v0  ;;  %490 = vmatpush3.bf16.msra.mxu1 %v538_v10 }
  0x5d   :  { %491 = vmatprep.subr.bf16.mxu1 %v678_v0  ;;  %502 = vmatpush3.bf16.msra.mxu0 %v542_v14 }
  0x5e   :  { %503 = vmatprep.subr.bf16.mxu0 %v678_v0 }
  0x60   :  { %492 = vmatpush3.bf16.msra.mxu1 %v539_v11 }
  0x61   :  { %493 = vmatprep.subr.bf16.mxu1 %v678_v0  ;;  %504 = vmatpush3.bf16.msra.mxu0 %v543_v15 }
  0x62   :  { %505 = vmatprep.subr.bf16.mxu0 %v678_v0 }
  0x64   :  { %494 = vmatpush3.bf16.msra.mxu1 %v540_v12 }
  0x65   :  { %495 = vmatprep.subr.bf16.mxu1 %v678_v0  ;;  %506 = vmatpush3.bf16.msra.mxu0 %v544_v16 }
  0x66   :  { %507 = vmatprep.subr.bf16.mxu0 %v678_v0 }
  0x68   :  { %496 = vmatpush3.bf16.msra.mxu1 %v541_v13 }
  0x69   :  { %508 = vmatpush3.bf16.msra.mxu0 %v545_v17 }
  0x6a   :  { %509 = vmatprep.subr.bf16.mxu0 %v678_v0 }
  0x6d   :  { %510 = vmatpush3.bf16.msra.mxu0 %v546_v18 }
  0x6e   :  { %511 = vmatprep.subr.bf16.mxu0 %v678_v0 }
  0x71   :  { %512 = vmatpush3.bf16.msra.mxu0 %v547_v19 }
  0x72   :  { %513 = vmatprep.subr.bf16.mxu0 %v678_v0 }
  0x75   :  { %514 = vmatpush3.bf16.msra.mxu0 %v548_v28 }
  0x76   :  { %515 = vmatprep.subr.bf16.mxu0 %v678_v0 }
  0x79   :  { %516 = vmatpush3.bf16.msra.mxu0 %v549_v29 }
 0x12e   :  { %v159_v21 = vpop.f32.mrb[0].mxu0 }
 0x12f   :  { %v160_v22 = vadd.f32 %v422_v20, %v159_v21  ;;  %v479_v23 = vpop.f32.mrb[1].mxu0 }
 0x130   :  { %v162_v24 = vpop.f32.mrb[2].mxu0 }
 0x131   :  { %v165_v25 = vmax.f32 %v160_v22, 0.0  ;;  %v480_v26 = vpop.f32.mrb[3].mxu0 }
 0x133   :  { %v166_v27 = vpack.c.bf16 %v165_v25, %v165_v25 }
 0x135   :  { %498 = vmatmul.mubr.bf16.vlgmr.msra.gmra.mrb[0].mxu1 %v166_v27 }
 0x208   :  { %v272_v31 = vpop.f32.mrb[0].mxu1 }
 0x209   :  { %v273_v32 = vadd.f32 %v428_v30, %v272_v31  ;;  %v499_v33 = vpop.f32.mrb[1].mxu1 }
 0x20a   :  { %v275_v34 = vpop.f32.mrb[2].mxu1 }
 0x20b   :  { %v278_v35 = vmax.f32 %v273_v32, 0.0  ;;  %v500_v36 = vpop.f32.mrb[3].mxu1 }
 0x20d   :  { %v279_v37 = vpack.c.bf16 %v278_v35, %v278_v35 }
 0x20f   :  { %518 = vmatmul.mubr.bf16.vlgmr.msra.gmra.mrb[4].mxu0 %v279_v37 }
 0x2e2   :  { %v385_v41 = vpop.f32.mrb[4].mxu0 }
 0x2e3   :  { %v386_v42 = vadd.f32 %v437_v40, %v385_v41  ;;  %v519_v43 = vpop.f32.mrb[5].mxu0 }
 0x2e4   :  { %v388_v44 = vpop.f32.mrb[6].mxu0 }
 0x2e5   :  { %v520_v45 = vpop.f32.mrb[7].mxu0  ;;  %v394_v46 = vsel %vm393_vm2, %v386_v42, -inf }
 0x2e6   :  { %395 = vmax.xlane.f32.xlu0 %v394_v46 }
 0x373   :  { %v396_v47 = vpop.xlane.xlu0 %395 }
 0x374   :  { %v397_v48 = vsub.f32 %v394_v46, %v396_v47 }
 0x376   :  { %v398_v49 = vmul.f32 1.442695, %v397_v48 }
 0x378   :  { %550 = vpow2.f32 %v398_v49 }
 0x382   :  { %v551_v50 = vpop.eup %550 }
 0x383   :  { %400 = vadd.xlane.f32.xlu0 %v551_v50 }
 0x410   :  { %v401_v51 = vpop.xlane.xlu0 %400 }
 0x411   :  { %552 = vrcp.f32 %v401_v51 }
 0x41b   :  { %v553_v52 = vpop.eup %552 }
 0x41c   :  { %v403_v53 = vmul.f32 %v553_v52, %v551_v50 }
 0x41e   :  { %404 = vst [vmem:[#allocation10] sm:$0xff] %v403_v53 }
 0x41f   :  { %653 = shalt.err (!%p650_p8)
}
 0x420   :  { %s654_s8 = scalar_lea.hbm %s832_s7, 128 }
 0x421   :  { %p655_p9 = scmp.ne.s32.totalorder %s832_s7, %s654_s8  ;;  %p658_p10 = scmp.lt.u32.totalorder %s654_s8, %s832_s7 }
 0x423   :  { %p660_p11 = pnand %p658_p10, %p655_p9 }
 0x425   :  { %663 = shalt.err (!%p660_p11)
}
 0x426   :  { %414 = dma.vmem_to_hbm [thread:$0]  %s412_s28, 128, %s832_s7, [#allocation4]  }
 0x427   :  { %670 = dma.done.wait [#allocation4], 128  }
 0x428   :  { %671 = vsyncadd [#allocation4], 4294967168 }
 0x429   :  { %418 = vsyncpa [#allocation3], 1 }
 0x42a   :  { %419 = vsyncpa [#allocation6], 1 }
 0x42b   :  { %420 = vsyncpa [#allocation9], 1 }
 0x42c   :  { %421 = vsyncpa [#allocation4], 1 }

</bundles_post_ra>
